<compile_context>
chip_gen: v6e
topology: v6e:2x2x1
jax: 0.10.0
libtpu: 0.0.40
codegen_flags: <defaults>
</compile_context>

<pallas_src>
import functools
import math

import jax
import jax.numpy as jnp
from jax.experimental import pallas as pl
from jax.experimental.pallas import tpu as pltpu

_NEG = jnp.float32(-1e30)          # stands in for -inf of PyTorch's masked_fill


@functools.lru_cache(maxsize=None)
def _vmem_limit_bytes():
    """75% of physical VMEM (48 MiB on v7x, 96 MiB on v5e/v6e), safe fallback 48 MiB."""
    cap = None
    try:
        info = pltpu.get_tpu_info()
        cap = getattr(info, "vmem_capacity_bytes", None)
    except Exception:
        cap = None
    if not cap:
        return 48 * 1024 * 1024
    return min(int(cap) * 3 // 4, 96 * 1024 * 1024)


def _pick_tile(dim, target, align):
    """Largest `align`-multiple divisor of `dim` that is <= target, else `dim` (full)."""
    if dim <= target:
        return dim
    t = (target // align) * align
    while t >= align:
        if dim % t == 0:
            return t
        t -= align
    return dim


# ---------------------------------------------------------------------------
# Tiled matmul + bias (bf16 operands, f32 accumulation)
# ---------------------------------------------------------------------------
def _matmul_bias_kernel(x_ref, w_ref, b_ref, o_ref, acc_ref):
    @pl.when(pl.program_id(2) == 0)
    def _():
        acc_ref[...] = jnp.zeros_like(acc_ref)

    # bf16 MXU operands, f32 accumulate (cast is a VPU op hidden under the MXU)
    acc_ref[...] += jnp.dot(x_ref[...].astype(jnp.bfloat16),
                            w_ref[...].astype(jnp.bfloat16),
                            preferred_element_type=jnp.float32)

    @pl.when(pl.program_id(2) == pl.num_programs(2) - 1)
    def _():
        o_ref[...] = (acc_ref[...] + b_ref[...]).astype(o_ref.dtype)


def matmul_bias(x, w, b, out_dtype):
    """x: (M, K), w: (K, N) bf16 (already transposed for x @ W), b: (N,) f32 -> (M, N)."""
    M, K = x.shape
    K2, N = w.shape
    assert K == K2
    # 256-wide output tiles feed the 2x256x256 MXU of v6e/v7x; still tiny VMEM.
    tm = _pick_tile(M, 256, 8)
    tn = _pick_tile(N, 256, 128)
    tk = _pick_tile(K, 512, 128)
    grid = (M // tm, N // tn, K // tk)
    return pl.pallas_call(
        _matmul_bias_kernel,
        out_shape=jax.ShapeDtypeStruct((M, N), out_dtype),
        grid_spec=pltpu.PrefetchScalarGridSpec(
            num_scalar_prefetch=0,
            grid=grid,
            in_specs=[
                pl.BlockSpec((tm, tk), lambda i, j, k: (i, k)),
                pl.BlockSpec((tk, tn), lambda i, j, k: (k, j)),
                pl.BlockSpec((1, tn), lambda i, j, k: (0, j)),
            ],
            out_specs=pl.BlockSpec((tm, tn), lambda i, j, k: (i, j)),
            scratch_shapes=[pltpu.VMEM((tm, tn), jnp.float32)],
        ),
        compiler_params=pltpu.CompilerParams(
            dimension_semantics=("parallel", "parallel", "arbitrary"),
            vmem_limit_bytes=_vmem_limit_bytes(),
        ),
    )(x, w, b.reshape(1, N))


# ---------------------------------------------------------------------------
# Flash-attention core (all heads of one batch element per grid step)
# ---------------------------------------------------------------------------
def _flash_attn_kernel(q_ref, k_ref, v_ref, am_ref, kpm_ref, o_ref,
                       m_sc, l_sc, acc_sc, *, causal, tq, tk):
    qi = pl.program_id(0)
    ki = pl.program_id(2)

    @pl.when(ki == 0)
    def _():
        m_sc[...] = jnp.full_like(m_sc, -jnp.inf)
        l_sc[...] = jnp.zeros_like(l_sc)
        acc_sc[...] = jnp.zeros_like(acc_sc)

    def compute():
        q = q_ref[0]            # (H, tq, Dh) bf16 -- Q pre-scaled via weight folding
        k = k_ref[0]            # (H, tk, Dh) bf16
        v = v_ref[0]            # (H, tk, Dh) bf16

        # combined additive mask built in-kernel (no (N*H,L,L) array in HBM);
        # the key-padding row is resident across the whole KV axis.
        col0 = pl.multiple_of(ki * tk, tk)
        bias = am_ref[...] + kpm_ref[0, :, pl.ds(col0, tk)]      # (tq,tk)+(1,tk)

        # batched contraction on last dims -> no K transpose, bf16 MXU, f32 acc
        s = jnp.einsum("hqd,hkd->hqk", q, k,
                       preferred_element_type=jnp.float32)       # (H, tq, tk)
        s = s + bias[None, :, :]

        # online softmax update (all statistics in f32)
        m_prev = m_sc[...]                                       # (H, tq, 1)
        m_new = jnp.maximum(m_prev, jnp.max(s, axis=-1, keepdims=True))
        alpha = jnp.exp(m_prev - m_new)
        p = jnp.exp(s - m_new)
        l_sc[...] = alpha * l_sc[...] + jnp.sum(p, axis=-1, keepdims=True)
        acc_sc[...] = alpha * acc_sc[...] + jnp.einsum(
            "hqk,hkd->hqd", p.astype(v.dtype), v,
            preferred_element_type=jnp.float32)
        m_sc[...] = m_new

    if causal:
        # skip KV tiles that lie entirely above the diagonal (fully masked);
        # contributes exactly 0 to the online softmax, so semantics are exact.
        pl.when(ki * tk < (qi + 1) * tq)(compute)
    else:
        compute()

    @pl.when(ki == pl.num_programs(2) - 1)
    def _():
        # EUP approximate reciprocal + one Newton refinement (off the hot KV loop)
        inv_l = pl.reciprocal(l_sc[...], approx=True)
        inv_l = inv_l * (2.0 - l_sc[...] * inv_l)
        acc = acc_sc[...] * inv_l                                # (H, tq, Dh) f32
        H = acc.shape[0]
        # one lane-dense (tq, H*Dh) slab, single store -> dense HBM writeback
        slab = jnp.concatenate([acc[h] for h in range(H)], axis=-1)
        o_ref[0] = slab.astype(o_ref.dtype)


def attention_core(q, k, v, attn_mask, kpm_bias, *, causal=False):
    """q,k,v: (N, H, L, Dh) bf16; attn_mask: (L, L) f32; kpm_bias: (N, 1, L) f32.
    Returns (N, L, H*Dh) with heads-major layout inside the last dim."""
    N, H, L, Dh = q.shape
    E = H * Dh
    tq = _pick_tile(L, 256, 8)       # bigger Q tile -> less KV re-streaming
    tk = _pick_tile(L, 256, 128)
    grid = (L // tq, N, L // tk)     # Q-tile axis first (v7x TC sharding), KV last
    kernel = functools.partial(_flash_attn_kernel, causal=causal, tq=tq, tk=tk)
    return pl.pallas_call(
        kernel,
        out_shape=jax.ShapeDtypeStruct((N, L, E), q.dtype),
        grid_spec=pltpu.PrefetchScalarGridSpec(
            num_scalar_prefetch=0,
            grid=grid,
            in_specs=[
                pl.BlockSpec((1, H, tq, Dh), lambda qi, b, ki: (b, 0, qi, 0)),
                pl.BlockSpec((1, H, tk, Dh), lambda qi, b, ki: (b, 0, ki, 0)),
                pl.BlockSpec((1, H, tk, Dh), lambda qi, b, ki: (b, 0, ki, 0)),
                pl.BlockSpec((tq, tk), lambda qi, b, ki: (qi, ki)),
                pl.BlockSpec((1, 1, L), lambda qi, b, ki: (b, 0, 0)),  # resident
            ],
            out_specs=pl.BlockSpec((1, tq, E), lambda qi, b, ki: (b, qi, 0)),
            scratch_shapes=[
                pltpu.VMEM((H, tq, 1), jnp.float32),   # running max
                pltpu.VMEM((H, tq, 1), jnp.float32),   # running denom
                pltpu.VMEM((H, tq, Dh), jnp.float32),  # accumulator
            ],
        ),
        compiler_params=pltpu.CompilerParams(
            dimension_semantics=("parallel", "parallel", "arbitrary"),
            vmem_limit_bytes=_vmem_limit_bytes(),
        ),
    )(q, k, v, attn_mask, kpm_bias)


# ---------------------------------------------------------------------------
# Module wrapper (parameter setup + glue in plain JAX)
# ---------------------------------------------------------------------------
class AttentionPallas:
    def __init__(self, hidden_dim, nhead, dropout, layer_id, key):
        assert hidden_dim % nhead == 0
        self.E = hidden_dim
        self.H = nhead
        self.Dh = hidden_dim // nhead
        self.layer_id = layer_id
        self.dropout = dropout  # inference path: unused

        k1, k2 = jax.random.split(key, 2)
        bound = 1.0 / math.sqrt(hidden_dim)
        # Canonical PyTorch-layout parameters (used by the pure-JAX reference).
        self.in_proj_w = jax.random.uniform(
            k1, (3 * hidden_dim, hidden_dim), jnp.float32, -bound, bound)
        self.in_proj_b = jnp.zeros((3 * hidden_dim,), jnp.float32)
        self.out_proj_w = jax.random.uniform(
            k2, (hidden_dim, hidden_dim), jnp.float32, -bound, bound)
        self.out_proj_b = jnp.zeros((hidden_dim,), jnp.float32)

        # Kernel-layout parameters: pre-transposed (x @ W), bf16 for the MXU,
        # with 1/sqrt(Dh) folded into the Q columns (no wrapper-side scale pass).
        scale = 1.0 / math.sqrt(self.Dh)
        col_scale = jnp.concatenate(
            [jnp.full((hidden_dim,), scale, jnp.float32),
             jnp.ones((2 * hidden_dim,), jnp.float32)])
        self._w_in = (self.in_proj_w.T * col_scale[None, :]).astype(jnp.bfloat16)
        self._b_in = self.in_proj_b * col_scale                  # (3E,) f32
        self._w_out = self.out_proj_w.T.astype(jnp.bfloat16)     # (E, E) bf16
        self._b_out = self.out_proj_b                            # (E,)  f32

    def __call__(self, x, attn_mask, key_padding_mask, *, causal=False):
        L, N, E = x.shape
        H, Dh = self.H, self.Dh

        # ---- input projection (tiled Pallas matmul; bf16 qkv, Q pre-scaled) ----
        qkv = matmul_bias(x.reshape(L * N, E), self._w_in, self._b_in,
                          out_dtype=jnp.bfloat16)                 # (L*N, 3E) bf16
        qkv = qkv.reshape(L, N, 3, H, Dh)
        # layout change to (N, H, L, Dh): done on bf16 data (half the HBM bytes)
        q = jnp.transpose(qkv[:, :, 0], (1, 2, 0, 3))
        k = jnp.transpose(qkv[:, :, 1], (1, 2, 0, 3))
        v = jnp.transpose(qkv[:, :, 2], (1, 2, 0, 3))

        # ---- tiny mask operands (combined inside the kernel) ----
        am = attn_mask.astype(jnp.float32)                                # (L, L)
        kpm = jnp.where(key_padding_mask, _NEG,
                        jnp.float32(0.0)).astype(jnp.float32)[:, None, :]  # (N,1,L)

        # ---- flash-attention core (Pallas) ----
        o = attention_core(q, k, v, am, kpm, causal=causal)   # (N, L, E) bf16

        # ---- output projection (tiled Pallas matmul, rows in (N*L) order) ----
        out = matmul_bias(o.reshape(N * L, E), self._w_out, self._b_out,
                          out_dtype=x.dtype)                   # (N*L, E) f32
        return jnp.swapaxes(out.reshape(N, L, E), 0, 1)        # (L, N, E)


# ---------------------------------------------------------------------------
# Pure-JAX reference (for correctness check, full f32)
# ---------------------------------------------------------------------------
def reference(module, x, attn_mask, key_padding_mask):
    L, N, E = x.shape
    H, Dh = module.H, module.Dh
    qkv = x @ module.in_proj_w.T + module.in_proj_b
    q, k, v = jnp.split(qkv, 3, axis=-1)

    def heads(t):
        return t.reshape(L, N * H, Dh).transpose(1, 0, 2)

    q, k, v = heads(q), heads(k), heads(v)
    q = q / math.sqrt(Dh)
    scores = jnp.einsum("bld,bmd->blm", q, k)
    kpm = jnp.where(key_padding_mask, _NEG, jnp.float32(0.0))
    mask = attn_mask[None, None] + kpm[:, None, None, :]
    mask = jnp.broadcast_to(mask, (N, H, L, L)).reshape(N * H, L, L)
    attn = jax.nn.softmax(scores + mask, axis=-1)
    o = jnp.einsum("blm,bmd->bld", attn, v)
    o = o.reshape(N, H, L, Dh).transpose(2, 0, 1, 3).reshape(L * N, E)
    out = o @ module.out_proj_w.T + module.out_proj_b
    return out.reshape(L, N, E)


if __name__ == "__main__":
    # Small but alignment-friendly shapes: seq=64, batch=2, hidden=128, heads=2.
    L, N, E, H = 64, 2, 128, 2

    kx = jax.random.PRNGKey(0)
    x = jax.random.normal(kx, (L, N, E), jnp.float32)

    # causal additive attn_mask (L, L)
    attn_mask = jnp.where(
        jnp.triu(jnp.ones((L, L), bool), k=1), _NEG, jnp.float32(0.0))
    # key_padding_mask (N, L): mask the last key position of batch 1
    key_padding_mask = jnp.zeros((N, L), bool).at[1, L - 1].set(True)

    module = AttentionPallas(hidden_dim=E, nhead=H, dropout=0.0, layer_id=0,
                             key=jax.random.PRNGKey(42))

    out = module(x, attn_mask, key_padding_mask, causal=True)
    out = jax.block_until_ready(out)

    ref = reference(module, x, attn_mask, key_padding_mask)
    assert out.shape == (L, N, E)
    err = jnp.max(jnp.abs(out - ref))
    # bf16 MXU operands (weights / qkv / attention output) lose ~3 decimal
    # digits vs the f32 reference; 2e-2 gives a comfortable margin.
    assert jnp.allclose(out, ref, atol=2e-2, rtol=2e-2), f"max abs err {err}"

    print("KERNEL_OK")
</pallas_src>

<mosaic_0001>
module attributes {stable_mosaic.version = 11 : i64} {
  func.func @_matmul_bias_kernel(%arg0: i32, %arg1: i32, %arg2: i32, %arg3: memref<128x128xf32, #tpu.memory_space<vmem>>, %arg4: memref<128x128xbf16, #tpu.memory_space<vmem>>, %arg5: memref<1x128xf32, #tpu.memory_space<vmem>>, %arg6: memref<128x128xbf16, #tpu.memory_space<vmem>>, %arg7: memref<128x128xf32, #tpu.memory_space<vmem>>) attributes {dimension_semantics = [#tpu.dimension_semantics<parallel>, #tpu.dimension_semantics<parallel>, #tpu.dimension_semantics<arbitrary>], iteration_bounds = array<i64: 1, 3, 1>, scalar_prefetch = 0 : i64, scratch_operands = 1 : i64, tpu.core_type = #tpu.core_type<tc>, window_params = [{transform_indices = @transform_0, window_bounds = array<i64: 128, 128>}, {transform_indices = @transform_1, window_bounds = array<i64: 128, 128>}, {transform_indices = @transform_2, window_bounds = array<i64: 1, 128>}, {transform_indices = @transform_3, window_bounds = array<i64: 128, 128>}]} {
    %c0_i32 = arith.constant 0 : i32
    %0 = arith.cmpi eq, %arg2, %c0_i32 : i32
    %1 = arith.extui %0 : i1 to i32
    %c0_i32_0 = arith.constant 0 : i32
    %2 = arith.cmpi ne, %1, %c0_i32_0 : i32
    scf.if %2 {
      %cst_10 = arith.constant 0.000000e+00 : f32
      %13 = vector.broadcast %cst_10 : f32 to vector<128x128xf32>
      %c0_11 = arith.constant 0 : index
      %c0_12 = arith.constant 0 : index
      %14 = vector.load %arg7[%c0_11, %c0_12] : memref<128x128xf32, #tpu.memory_space<vmem>>, vector<128x128xf32>
      tpu.vector_store %arg7[%c0_11, %c0_12], %13 {strides = array<i32>} : memref<128x128xf32, #tpu.memory_space<vmem>>, vector<128x128xf32>,
    } else {
    }
    %c0 = arith.constant 0 : index
    %c0_1 = arith.constant 0 : index
    %3 = vector.load %arg7[%c0, %c0_1] : memref<128x128xf32, #tpu.memory_space<vmem>>, vector<128x128xf32>
    %c0_2 = arith.constant 0 : index
    %c0_3 = arith.constant 0 : index
    %4 = vector.load %arg3[%c0_2, %c0_3] : memref<128x128xf32, #tpu.memory_space<vmem>>, vector<128x128xf32>
    %5 = arith.truncf %4 : vector<128x128xf32> to vector<128x128xbf16>
    %c0_4 = arith.constant 0 : index
    %c0_5 = arith.constant 0 : index
    %6 = vector.load %arg4[%c0_4, %c0_5] : memref<128x128xbf16, #tpu.memory_space<vmem>>, vector<128x128xbf16>
    %cst = arith.constant dense<0.000000e+00> : vector<128x128xf32>
    %7 = tpu.matmul %5, %6, %cst {dimension_numbers = #tpu.dot_dimension_numbers<[1], [0], [0], [1], [0, 0, 1, 1], [], []>} : vector<128x128xbf16>, vector<128x128xbf16>, vector<128x128xf32> -> vector<128x128xf32>
    %8 = arith.addf %3, %7 : vector<128x128xf32>
    %c0_6 = arith.constant 0 : index
    %c0_7 = arith.constant 0 : index
    %9 = vector.load %arg7[%c0_6, %c0_7] : memref<128x128xf32, #tpu.memory_space<vmem>>, vector<128x128xf32>
    tpu.vector_store %arg7[%c0_6, %c0_7], %8 {strides = array<i32>} : memref<128x128xf32, #tpu.memory_space<vmem>>, vector<128x128xf32>,
    %c0_i32_8 = arith.constant 0 : i32
    %10 = arith.cmpi eq, %arg2, %c0_i32_8 : i32
    %11 = arith.extui %10 : i1 to i32
    %c0_i32_9 = arith.constant 0 : i32
    %12 = arith.cmpi ne, %11, %c0_i32_9 : i32
    scf.if %12 {
      %c0_10 = arith.constant 0 : index
      %c0_11 = arith.constant 0 : index
      %13 = vector.load %arg7[%c0_10, %c0_11] : memref<128x128xf32, #tpu.memory_space<vmem>>, vector<128x128xf32>
      %c0_12 = arith.constant 0 : index
      %c0_13 = arith.constant 0 : index
      %14 = vector.load %arg5[%c0_12, %c0_13] : memref<1x128xf32, #tpu.memory_space<vmem>>, vector<1x128xf32>
      %15 = vector.broadcast %14 : vector<1x128xf32> to vector<128x128xf32>
      %16 = arith.addf %13, %15 : vector<128x128xf32>
      %17 = arith.truncf %16 : vector<128x128xf32> to vector<128x128xbf16>
      %c0_14 = arith.constant 0 : index
      %c0_15 = arith.constant 0 : index
      %18 = vector.load %arg6[%c0_14, %c0_15] : memref<128x128xbf16, #tpu.memory_space<vmem>>, vector<128x128xbf16>
      tpu.vector_store %arg6[%c0_14, %c0_15], %17 {strides = array<i32>} : memref<128x128xbf16, #tpu.memory_space<vmem>>, vector<128x128xbf16>,
    } else {
    }
    return
  }
  func.func @transform_0(%arg0: i32, %arg1: i32, %arg2: i32) -> (i32, i32) {
    %c0_i32 = arith.constant 0 : i32
    return %arg0, %arg2 : i32, i32
  }
  func.func @transform_1(%arg0: i32, %arg1: i32, %arg2: i32) -> (i32, i32) {
    %c0_i32 = arith.constant 0 : i32
    return %arg2, %arg1 : i32, i32
  }
  func.func @transform_2(%arg0: i32, %arg1: i32, %arg2: i32) -> (i32, i32) {
    %c0_i32 = arith.constant 0 : i32
    %c0_i32_0 = arith.constant 0 : i32
    return %c0_i32, %arg1 : i32, i32
  }
  func.func @transform_3(%arg0: i32, %arg1: i32, %arg2: i32) -> (i32, i32) {
    %c0_i32 = arith.constant 0 : i32
    return %arg0, %arg1 : i32, i32
  }
}

</mosaic_0001>

<bundles_post_ra>
// kernel: tpu_custom_call.1
= control target key start
LH: loop header
LB: loop body
LE: loop exit
PB: predicated region body
PF: predicated region fallthrough
CT: control target
= control target key end

     0   :  { %8 = vsyncpa [#allocation4], 0  ;;  %s1392_s0 = inlined_call_operand.hbm [shape: f32[128,128], index: 0, kind: input, shape index: {}]   ;;  %s1393_s1 = inlined_call_operand.hbm [shape: bf16[128,384], index: 1, kind: input, shape index: {}]   ;;  %s1394_s2 = inlined_call_operand.vmem [shape: f32[1,384], index: 2, kind: input, shape index: {}]   ;;  %s1395_s3 = inlined_call_operand.hbm [shape: bf16[128,384], index: 3, kind: output, shape index: {}]  }
   0x1   :  { %9 = vsyncpa [#allocation7], 0 }
   0x2   :  { %11 = vsyncpa [#allocation7 + $0x1], 0 }
   0x3   :  { %12 = vsyncpa [#allocation5], 0 }
   0x4   :  { %14 = vsyncpa [#allocation5 + $0x1], 0  ;;  %s1189_s12 = smov 0   ;;  %s1191_s13 = smov 0  }
   0x5   :  { %s1193_s14 = smov 0   ;;  %s1195_s15 = smov 0  }
   0x6   :  { %s1197_s16 = smov 0   ;;  %s1199_s17 = smov 0  }
   0x7 LB: > { %1400 = sst [smem:[#allocation12_spill]] %s1136_s12  ;;  %s762_s18 = sadd.s32 4294967295, %s1156_s17   ;;  %s1156_s17 = sphi %s1199_s17, %s20_s17   ;;  %s1152_s16 = sphi %s1197_s16, %s1420_s16   ;;  %s1148_s15 = sphi %s1195_s15, %s1419_s15   ;;  %s1144_s14 = sphi %s1193_s14, %s1418_s14   ;;  %s1140_s13 = sphi %s1191_s13, %s1417_s13   ;;  %s1136_s12 = sphi %s1189_s12, %s1416_s12  }
   0x8   : > { %s763_s19 = sadd.s32 4294967294, %s1156_s17   ;;  %p83_p0 = scmp.ne.s32.totalorder %s1144_s14, %s1140_s13 }
   0x9   : > { %p84_p1 = scmp.eq.s32.totalorder %s1156_s17, 0  ;;  %p89_p2 = scmp.ne.s32.totalorder %s1140_s13, %s1136_s12 }
   0xa   : > { %p1226_p3 = scmp.eq.s32.totalorder %s762_s18, 0  ;;  %p141_p5 = scmp.eq.s32.totalorder %s762_s18, 2 }
   0xb   : > { %p1230_p4 = por %p84_p1, %p83_p0  ;;  %p147_p7 = scmp.eq.s32.totalorder %s763_s19, 2 }
   0xc   : > { %p1236_p6 = por %p1226_p3, %p89_p2  ;;  %p1240_p8 = por %p141_p5, %p83_p0 }
   0xd   : > { %p764_p9 = scmp.ge.s32.totalorder %s1156_s17, 1  ;;  %p1245_p10 = por %p147_p7, %p89_p2 }
   0xe   : > { %s1403_s22 = scalar_select %p1236_p6, 1, 0 }
   0xf   : > { %s1404_s23 = scalar_select %p1240_p8, 1, 0 }
  0x10   : > { %s1405_s24 = scalar_select %p1245_p10, 1, 0 }
  0x11   : > { %p154_p11 = scmp.lt.s32.totalorder %s1156_s17, 4  ;;  %s1158_s26 = smov [#allocation3]  }
  0x12   : > { %1406 = sst [smem:[#allocation13_spill]] %s1405_s24  ;;  %s170_s27 = sshll.u32 %s1158_s26, 4  ;;  %s171_s27 = int_to_ptr.vmem [resolvable:$true] %s170_s27 }
  0x13   : > { %p1250_p12 = pnand %p764_p9, %p154_p11  ;;  %p950_p0 = scmp.lt.s32.totalorder %s1156_s17, 3 }
  0x14   : > { %s35_s30 = sadd.s32 1, %s1152_s16  ;;  %s1029_s4 = scalar_lea.vmem %s171_s27, 2048 }
  0x15   : > { %p937_p13 = pneg %p1250_p12  ;;  %p1265_p2 = pnand %p950_p0, %p1230_p4 }
  0x16   : > { %p1030_p7 = scmp.ne.s32.totalorder %s171_s27, %s1029_s4  ;;  %p1037_p10 = scmp.lt.s32.totalorder %s171_s27, %s171_s27 }
  0x17   : > { %p1259_p1 = pnand %p937_p13, %p1226_p3  ;;  %p1038_p8 = scmp.lt.s32.totalorder %s1029_s4, %s1029_s4 }
  0x19   : > { %p1020_p5 = pneg %p1259_p1  ;;  %p1039_p6 = por %p1038_p8, %p1037_p10 }
  0x1b   : > { %p1032_p9 = pnand %p1030_p7, %p1020_p5 }
  0x1d   : > { %p1033_p11 = pneg %p1032_p9 }
  0x1f   : > { %p1040_p13 = pnand %p1039_p6, %p1033_p11 }
  0x21   : > { %1043 = shalt.err (!%p1040_p13)
}
  0x22   : > { %s1159_s5 = smov 128   ;;  %s1160_s6 = smov 8  }
  0x23   : > { %940 = dma.hbm_to_vmem [thread:$0]  (!%p1259_p1), %s1392_s0, 2048, %s171_s27, [#allocation4], %s1159_s5, %s1159_s5, %s1160_s6  }
  0x24   : > { %p37_p4 = scmp.ge.s32.totalorder %s35_s30, 3  ;;  %s76_s9 = sadd.s32 1, %s1144_s14 }
  0x25   : > { %s184_s10 = sand.u32 1, %s1144_s14   ;;  %s768_s19 = sshll.u32 %s1152_s16, 6 }
  0x26   : > { %s1422_s30 = smov (%p37_p4, %s35_s30), 0  ;;  %s767_s11 = sshll.u32 %s184_s10, 6 }
  0x27   : > { %s72_s18 = ssub.s32 %s1152_s16, %s1422_s30  ;;  %s196_s4 = scalar_lea.hbm %s1393_s1, %s768_s19 }
  0x28   : > { %p74_p6 = scmp.eq.s32.totalorder %s72_s18, 0  ;;  %s188_s28 = scalar_lea.vmem [#allocation6], %s767_s11 }
  0x29   : > { %s197_s24 = sshll.u32 %s188_s28, 4  ;;  %s185_s27 = scalar_lea.sflag [#allocation7], %s184_s10  ;;  %s198_s24 = int_to_ptr.vmem [resolvable:$true] %s197_s24 }
  0x2a   : > { %s1288_s12 = scalar_select %p74_p6, %s1144_s14, %s76_s9  }
  0x2b   : > { %p1046_p8 = pneg %p1265_p2  ;;  %s1057_s5 = scalar_lea.vmem %s198_s24, 1024 }
  0x2c   : > { %p1058_p10 = scmp.ne.s32.totalorder %s198_s24, %s1057_s5  ;;  %s1161_s6 = smov [#allocation6]  }
  0x2d   : > { %s1062_s7 = sshll.u32 %s1161_s6, 4  ;;  %s1063_s7 = int_to_ptr.vmem [resolvable:$false] %s1062_s7 }
  0x2e   : > { %p1060_p0 = pnand %p1058_p10, %p1046_p8  ;;  %s1064_s8 = scalar_lea.vmem %s1063_s7, 2048 }
  0x2f   : > { %p1065_p5 = scmp.lt.s32.totalorder %s198_s24, %s1063_s7  ;;  %p1066_p7 = scmp.lt.s32.totalorder %s1064_s8, %s1057_s5 }
  0x30   : > { %p1061_p1 = pneg %p1060_p0 }
  0x31   : > { %p1067_p9 = por %p1066_p7, %p1065_p5 }
  0x33   : > { %p1068_p11 = pnand %p1067_p9, %p1061_p1 }
  0x35   : > { %1071 = shalt.err (!%p1068_p11)
}
  0x36   : > { %s1162_s11 = smov 192   ;;  %s1163_s9 = smov 64  }
  0x37   : > { %s1164_s18 = smov 4   ;;  %215 = sbr.rel (%p1250_p12) target bundleno = 324 (0x144), region = 32 }
  0x38   : > { %944 = dma.hbm_to_vmem [thread:$0]  (!%p1265_p2), %s196_s4, 1024, %s198_s24, %s185_s27, %s1162_s11, %s1163_s9, %s1164_s18  }
  0x3c   : > { %1123 = dma.done.wait (%p1226_p3), [#allocation4], 2048  }
  0x3d   : > { %1125 = vsyncadd (%p1226_p3), [#allocation4], 4294965248  ;;  %s1301_s10 = sand.u32 1, %s1140_s13   ;;  %p1410_p2 = scmp.ne.s32.totalorder %s1403_s22, 0 }
  0x3e   : > { %s771_s19 = sshll.u32 %s1301_s10, 6  ;;  %s222_s21 = scalar_lea.sflag [#allocation7], %s1301_s10 }
  0x3f   : > { %s1307_s24 = scalar_lea.vmem [#allocation6], %s771_s19 }
  0x40   : > { %1127 = dma.done.wait (%p1410_p2), %s222_s21, 1024  }
  0x41   : > { %1129 = vsyncadd (%p1410_p2), %s222_s21, 4294966272  ;;  %v1010_v0 = vld [vmem:[%s1307_s24 + $0x38] sm:$0xff]   ;;  %v1011_v1 = vld [vmem:[%s1307_s24 + $0x30] sm:$0xff]   ;;  %p253_p3 = scmp.lt.s32.totalorder %s1148_s15, 2  ;;  %s1328_s26 = scalar_lea.vmem [#allocation8], %s771_s19 }
  0x42   : > { %881 = vmatprep.subr.bf16.mxu0 %v1010_v0  ;;  %913 = vmatprep.subr.bf16.mxu1 %v1010_v0  ;;  %v1012_v2 = vld [vmem:[%s1307_s24 + $0x28] sm:$0xff]   ;;  %v1013_v3 = vld [vmem:[%s1307_s24 + $0x20] sm:$0xff]   ;;  %v1014_v10 = vld [vmem:[%s1307_s24 + $0x18] sm:$0xff]   ;;  %s649_s4 = sshll.u32 %s1328_s26, 4  ;;  %s799_s28 = sshll.u32 %s1148_s15, 6  ;;  %s1336_s4 = int_to_ptr.vmem [resolvable:$true] %s649_s4 }
  0x43   : > { %882 = vmatpush3.bf16.msra.mxu0 %v1010_v0  ;;  %921 = vmatpush3.bf16.msra.mxu1 %v1010_v0  ;;  %v294_v4 = vld [vmem:[#allocation3] sm:$0xff]  ;;  %v295_v5 = vld [vmem:[#allocation3 + $0x8] sm:$0xff]  ;;  %v1015_v11 = vld [vmem:[%s1307_s24 + $0x10] sm:$0xff]   ;;  %s254_s20 = scalar_select %p253_p3, %s1148_s15, 2 }
  0x44   : > { %883 = vmatprep.subr.bf16.mxu0 %v1011_v1  ;;  %914 = vmatprep.subr.bf16.mxu1 %v1011_v1  ;;  %v302_v6 = vld [vmem:[#allocation3 + $0x40] sm:$0xff]  ;;  %v310_v7 = vpack.c.bf16 %v295_v5, %v294_v4  ;;  %v303_v8 = vld [vmem:[#allocation3 + $0x48] sm:$0xff]  ;;  %v296_v14 = vld [vmem:[#allocation3 + $0x10] sm:$0xff]  ;;  %s1341_s6 = scalar_lea.hbm %s1395_s3, %s799_s28  ;;  %s634_s15 = scalar_lea.sflag [#allocation5], %s1301_s10 }
  0x45   : > { %v314_v9 = vpack.c.bf16 %v303_v8, %v302_v6  ;;  %v1016_v12 = vld [vmem:[%s1307_s24 + $0x8] sm:$0xff]   ;;  %v1017_v13 = vld [vmem:[%s1307_s24] sm:$0xff]   ;;  %v297_v15 = vld [vmem:[#allocation3 + $0x18] sm:$0xff]  ;;  %s255_s29 = scalar_lea.vmem %s1394_s2, %s254_s20  ;;  %s1072_s7 = scalar_lea.vmem %s1336_s4, 1024 }
  0x46   : > { %897 = vmatprep.mubr.bf16.mxu0 %v310_v7  ;;  %v304_v16 = vld [vmem:[#allocation3 + $0x50] sm:$0xff]  ;;  %v305_v17 = vld [vmem:[#allocation3 + $0x58] sm:$0xff]  ;;  %v298_v18 = vld [vmem:[#allocation3 + $0x20] sm:$0xff]  ;;  %v311_v22 = vpack.c.bf16 %v297_v15, %v296_v14  ;;  %p1073_p12 = scmp.ne.s32.totalorder %s1336_s4, %s1072_s7  ;;  %p1411_p13 = scmp.ne.s32.totalorder %s1404_s23, 0 }
  0x47   : > { %884 = vmatpush3.bf16.msra.mxu0 %v1011_v1  ;;  %922 = vmatpush3.bf16.msra.mxu1 %v1011_v1  ;;  %v299_v19 = vld [vmem:[#allocation3 + $0x28] sm:$0xff]  ;;  %v306_v20 = vld [vmem:[#allocation3 + $0x60] sm:$0xff]  ;;  %v315_v23 = vpack.c.bf16 %v305_v17, %v304_v16  ;;  %v300_v26 = vld [vmem:[#allocation3 + $0x30] sm:$0xff]  ;;  %s1165_s8 = smov [#allocation8]  }
  0x48   : > { %885 = vmatprep.subr.bf16.mxu0 %v1012_v2  ;;  %915 = vmatprep.subr.bf16.mxu1 %v1012_v2  ;;  %v307_v21 = vld [vmem:[#allocation3 + $0x68] sm:$0xff]  ;;  %v312_v24 = vpack.c.bf16 %v299_v19, %v298_v18  ;;  %v301_v27 = vld [vmem:[#allocation3 + $0x38] sm:$0xff]  ;;  %v308_v28 = vld [vmem:[#allocation3 + $0x70] sm:$0xff]  ;;  %p1074_p4 = pnand %p1073_p12, %p1411_p13  ;;  %s1076_s11 = sshll.u32 %s1165_s8, 4  ;;  %s1077_s11 = int_to_ptr.vmem [resolvable:$false] %s1076_s11 }
  0x49   : > { %905 = vmatprep.mubr.bf16.mxu1 %v314_v9  ;;  %v316_v25 = vpack.c.bf16 %v307_v21, %v306_v20  ;;  %v309_v29 = vld [vmem:[#allocation3 + $0x78] sm:$0xff]  ;;  %v313_v30 = vpack.c.bf16 %v301_v27, %v300_v26  ;;  %v781_v34 = vld [vmem:[%s255_s29] ss:$0 sm:$0xff]  ;;  %s1078_s9 = scalar_lea.vmem %s1077_s11, 2048  ;;  %p1079_p8 = scmp.lt.s32.totalorder %s1336_s4, %s1077_s11 }
  0x4a   : > { %v317_v31 = vpack.c.bf16 %v309_v29, %v308_v28  ;;  %p1075_p6 = pneg %p1074_p4  ;;  %p1080_p10 = scmp.lt.s32.totalorder %s1078_s9, %s1072_s7 }
  0x4b   : > { %886 = vmatpush3.bf16.msra.mxu0 %v1012_v2  ;;  %923 = vmatpush3.bf16.msra.mxu1 %v1012_v2 }
  0x4c   : > { %887 = vmatprep.subr.bf16.mxu0 %v1013_v3  ;;  %916 = vmatprep.subr.bf16.mxu1 %v1013_v3  ;;  %p1081_p0 = por %p1080_p10, %p1079_p8 }
  0x4e   : > { %p1082_p1 = pnand %p1081_p0, %p1075_p6 }
  0x4f   : > { %888 = vmatpush3.bf16.msra.mxu0 %v1013_v3  ;;  %924 = vmatpush3.bf16.msra.mxu1 %v1013_v3 }
  0x50   : > { %889 = vmatprep.subr.bf16.mxu0 %v1014_v10  ;;  %917 = vmatprep.subr.bf16.mxu1 %v1014_v10 }
  0x53   : > { %890 = vmatpush3.bf16.msra.mxu0 %v1014_v10  ;;  %925 = vmatpush3.bf16.msra.mxu1 %v1014_v10 }
  0x54   : > { %891 = vmatprep.subr.bf16.mxu0 %v1015_v11  ;;  %918 = vmatprep.subr.bf16.mxu1 %v1015_v11 }
  0x57   : > { %892 = vmatpush3.bf16.msra.mxu0 %v1015_v11  ;;  %926 = vmatpush3.bf16.msra.mxu1 %v1015_v11 }
  0x58   : > { %893 = vmatprep.subr.bf16.mxu0 %v1016_v12  ;;  %919 = vmatprep.subr.bf16.mxu1 %v1016_v12 }
  0x5b   : > { %894 = vmatpush3.bf16.msra.mxu0 %v1016_v12  ;;  %927 = vmatpush3.bf16.msra.mxu1 %v1016_v12 }
  0x5c   : > { %895 = vmatprep.subr.bf16.mxu0 %v1017_v13  ;;  %920 = vmatprep.subr.bf16.mxu1 %v1017_v13 }
  0x5f   : > { %896 = vmatpush3.bf16.msra.mxu0 %v1017_v13  ;;  %928 = vmatpush3.bf16.msra.mxu1 %v1017_v13 }
  0x62   : > { %898 = vmatmul.mubr.bf16.vlgmr.msra.gmra.mxu0 %v311_v22  ;;  %906 = vmatmul.mubr.bf16.vlgmr.msra.gmra.mxu1 %v315_v23 }
  0x63   : > { %901 = vmatprep.mubr.bf16.mxu0 %v312_v24  ;;  %909 = vmatprep.mubr.bf16.mxu1 %v316_v25 }
  0x6a   : > { %902 = vmatmul.mubr.bf16.gmra.mxu0 %v313_v30  ;;  %910 = vmatmul.mubr.bf16.gmra.mxu1 %v317_v31 }
 0x122   : > { %v899_v32 = vpop.f32.mrf.mxu0  ;;  %v907_v33 = vpop.f32.mrf.mxu1 }
 0x123   : > { %v539_v39 = vadd.f32 %v899_v32, %v781_v34  ;;  %v547_v40 = vadd.f32 %v907_v33, %v781_v34 }
 0x124   : > { %v416_v35 = vpop.f32.mrf.mxu0  ;;  %v448_v36 = vpop.f32.mrf.mxu1 }
 0x125   : > { %v537_v43 = vadd.f32 %v781_v34, %v416_v35  ;;  %v545_v44 = vadd.f32 %v781_v34, %v448_v36 }
 0x126   : > { %v900_v37 = vpop.f32.mrf.mxu0  ;;  %v908_v38 = vpop.f32.mrf.mxu1 }
 0x127   : > { %v540_v41 = vadd.f32 %v900_v37, %v781_v34  ;;  %v548_v42 = vadd.f32 %v908_v38, %v781_v34 }
 0x128   : > { %v419_v45 = vpop.f32.mrf.mxu0  ;;  %v451_v46 = vpop.f32.mrf.mxu1 }
 0x129   : > { %v826_v47 = vpack.c.bf16 %v540_v41, %v539_v39  ;;  %v846_v48 = vpack.c.bf16 %v548_v42, %v547_v40  ;;  %v538_v49 = vadd.f32 %v781_v34, %v419_v45  ;;  %v546_v50 = vadd.f32 %v781_v34, %v451_v46 }
 0x12a   : > { %v903_v51 = vpop.f32.mrf.mxu0  ;;  %v911_v52 = vpop.f32.mrf.mxu1 }
 0x12b   : > { %858 = vst [vmem:[%s1328_s26 + $0x8] sm:$0xff] %v826_v47   ;;  %862 = vst [vmem:[%s1328_s26 + $0x28] sm:$0xff] %v846_v48   ;;  %v821_v53 = vpack.c.bf16 %v538_v49, %v537_v43  ;;  %v841_v54 = vpack.c.bf16 %v546_v50, %v545_v44  ;;  %v543_v59 = vadd.f32 %v903_v51, %v781_v34 }
 0x12c   : > { %v432_v55 = vpop.f32.mrf.mxu0  ;;  %v464_v56 = vpop.f32.mrf.mxu1  ;;  %v551_v60 = vadd.f32 %v911_v52, %v781_v34 }
 0x12d   : > { %822 = vst [vmem:[%s1328_s26] sm:$0xff] %v821_v53   ;;  %861 = vst [vmem:[%s1328_s26 + $0x20] sm:$0xff] %v841_v54   ;;  %v541_v63 = vadd.f32 %v781_v34, %v432_v55  ;;  %v549_v0 = vadd.f32 %v781_v34, %v464_v56 }
 0x12e   : > { %v904_v57 = vpop.f32.mrf.mxu0  ;;  %v912_v58 = vpop.f32.mrf.mxu1 }
 0x12f   : > { %v544_v61 = vadd.f32 %v904_v57, %v781_v34  ;;  %v552_v62 = vadd.f32 %v912_v58, %v781_v34 }
 0x130   : > { %v435_v1 = vpop.f32.mrf.mxu0  ;;  %v467_v2 = vpop.f32.mrf.mxu1 }
 0x131   : > { %v836_v3 = vpack.c.bf16 %v544_v61, %v543_v59  ;;  %v856_v4 = vpack.c.bf16 %v552_v62, %v551_v60  ;;  %v542_v5 = vadd.f32 %v781_v34, %v435_v1  ;;  %v550_v6 = vadd.f32 %v781_v34, %v467_v2 }
 0x133   : > { %860 = vst [vmem:[%s1328_s26 + $0x18] sm:$0xff] %v836_v3   ;;  %864 = vst [vmem:[%s1328_s26 + $0x38] sm:$0xff] %v856_v4   ;;  %v831_v7 = vpack.c.bf16 %v542_v5, %v541_v63  ;;  %v851_v8 = vpack.c.bf16 %v550_v6, %v549_v0 }
 0x135   : > { %859 = vst [vmem:[%s1328_s26 + $0x10] sm:$0xff] %v831_v7   ;;  %863 = vst [vmem:[%s1328_s26 + $0x30] sm:$0xff] %v851_v8  }
 0x136   : > { %1085 = shalt.err (!%p1082_p1)
}
 0x137   : > { %s1086_s18 = scalar_lea.hbm %s1341_s6, 1024  ;;  %s1090_s24 = scalar_lea.hbm %s1395_s3, 3072 }
 0x138   : > { %p1087_p5 = scmp.ne.s32.totalorder %s1341_s6, %s1086_s18  ;;  %p1091_p11 = scmp.lt.s32.totalorder %s1341_s6, %s1395_s3 }
 0x139   : > { %p1092_p2 = scmp.lt.s32.totalorder %s1090_s24, %s1086_s18 }
 0x13a   : > { %p1088_p7 = pnand %p1087_p5, %p1411_p13 }
 0x13b   : > { %p1093_p3 = por %p1092_p2, %p1091_p11 }
 0x13c   : > { %p1089_p9 = pneg %p1088_p7 }
 0x13e   : > { %p1094_p12 = pnand %p1093_p3, %p1089_p9 }
 0x140   : > { %1097 = shalt.err (!%p1094_p12)
}
 0x141   : > { %s1166_s25 = smov 64   ;;  %s1167_s29 = smov 192  }
 0x142   : > { %s1168_s26 = smov 4  }
 0x143   : > { %935 = dma.vmem_to_hbm [thread:$0]  (%p1411_p13), %s1336_s4, 1024, %s1341_s6, %s634_s15, %s1166_s25, %s1167_s29, %s1168_s26  }
 0x144 PF: > { %s1412_s28 = sld [smem:[#allocation12_spill]]  ;;  %p952_p4 = scmp.ge.s32.totalorder %s1156_s17, 2 }
 0x145   : > { %s1413_s27 = sld [smem:[#allocation13_spill]] }
 0x14a   : > { %s664_s5 = sand.u32 1, %s1412_s28  }
 0x14b   : > { %p1414_p6 = scmp.ne.s32.totalorder %s1413_s27, 0  ;;  %s665_s7 = scalar_lea.sflag [#allocation5], %s664_s5 }
 0x14d   : > { %p946_p8 = pnand %p952_p4, %p1414_p6 }
 0x14f   : > { %p947_p10 = pneg %p946_p8 }
 0x151   : > { %1131 = dma.done.wait (%p947_p10), %s665_s7, 1024  }
 0x152   : > { %1133 = vsyncadd (%p947_p10), %s665_s7, 4294966272  ;;  %s20_s17 = sadd.s32 1, %s1156_s17   ;;  %s1415_s23 = smov %s1288_s12 }
 0x153   : > { %p17_p0 = scmp.ge.s32.totalorder %s20_s17, 5   ;;  %s1416_s12 = smov %s1140_s13 }
 0x154   : > { %s1417_s13 = smov %s1144_s14  ;;  %s1418_s14 = smov %s1415_s23 }
 0x155   : > { %s1419_s15 = smov %s1152_s16  ;;  %s1420_s16 = smov %s1422_s30 }
 0x156   :  { %19 = sbr.rel (!%p17_p0) target bundleno = 7 (0x7), region = 94 }
 0x15b   :  { %670 = vsyncpa [#allocation4], 1 }
 0x15c   :  { %672 = vsyncpa [#allocation4 + $0x1], 1 }
 0x15d   :  { %673 = vsyncpa [#allocation7], 1 }
 0x15e   :  { %675 = vsyncpa [#allocation7 + $0x1], 1 }
 0x15f   :  { %676 = vsyncpa [#allocation5], 1 }
 0x160   :  { %678 = vsyncpa [#allocation5 + $0x1], 1 }

</bundles_post_ra>
